<compile_context>
chip_gen: v7x
topology: tpu7x:2x2x1
jax: 0.10.0
libtpu: 0.0.40
codegen_flags: <defaults>
</compile_context>

<pallas_src>
import jax
import jax.numpy as jnp
from jax.experimental import pallas as pl
from jax.experimental.pallas import tpu as pltpu

CP = 8  # channel padding: packed lane index = w * CP + c


def _cycle_kernel(x_ref, mdn_ref, mup_ref, w_ref, b_ref, o_ref):
    a = x_ref[...]                       # (M, WCP) f32 lane-dense activations
    mdn = mdn_ref[...]                   # (M, 1) f32: 0 on each image's top row
    mup = mup_ref[...]                   # (M, 1) f32: 0 on each image's bottom row
    m = a.shape[0]
    wcp = a.shape[1]

    def conv3x3(act, stage, act_fn):
        # ONE well-shaped MXU matmul per conv: (M,128) x (128,384), bf16 in,
        # f32 accumulation.  Output columns = the three vertical-tap partials.
        y = jnp.dot(act.astype(jnp.bfloat16), w_ref[stage],
                    preferred_element_type=jnp.float32)        # (M, 3*WCP)
        y0 = y[:, :wcp]              # ky=0 partial (needs input row h-1)
        y1 = y[:, wcp:2 * wcp]       # ky=1 partial (input row h)
        y2 = y[:, 2 * wcp:]          # ky=2 partial (needs input row h+1)
        # Vertical taps: sublane rolls (XLU) + per-image border masks (VPU).
        out = (pltpu.roll(y0, 1, axis=0) * mdn
               + y1
               + pltpu.roll(y2, m - 1, axis=0) * mup
               + b_ref[stage])                                  # fused bias
        return act_fn(out)                                      # f32 epilogue

    relu = lambda v: jnp.maximum(v, 0.0)
    a = conv3x3(a, 0, relu)      # content = gen_a.encode(x_a)
    a = conv3x3(a, 1, jnp.tanh)  # x_ab    = gen_b.decode(content)
    a = conv3x3(a, 2, relu)      # content = gen_b.encode(x_ab)
    a = conv3x3(a, 3, jnp.tanh)  # x_aba   = gen_a.decode(content)
    o_ref[...] = a               # full-width lane-dense store


def _stacked_weight(w_hwio, W):
    """Fold a 3x3 HWIO conv kernel into a (W*CP, 3*W*CP) matmul operand.
    Row = wi*CP + ci (input lane); col = ky*(W*CP) + wo*CP + co; entries with
    |wi - wo| > 1 are zero (encodes SAME zero padding along W)."""
    _, _, cin, cout = w_hwio.shape
    kp = jnp.zeros((3, 3, CP, CP), w_hwio.dtype).at[:, :, :cin, :cout].set(w_hwio)
    wi = jnp.arange(W)[:, None]
    wo = jnp.arange(W)[None, :]
    kx = wi - wo + 1                                           # horizontal tap index
    valid = ((kx >= 0) & (kx <= 2)).astype(w_hwio.dtype)       # (W, W) band mask
    t = kp[:, jnp.clip(kx, 0, 2)] * valid[None, :, :, None, None]  # (ky,wi,wo,ci,co)
    t = jnp.transpose(t, (1, 3, 0, 2, 4))                      # (wi, ci, ky, wo, co)
    return t.reshape(W * CP, 3 * W * CP)


def _lane_bias(b, W):
    bp = jnp.zeros((CP,), b.dtype).at[: b.shape[-1]].set(b.reshape(-1))
    return jnp.tile(bp, W).reshape(1, W * CP)


def prepare_params(params, N, H, W):
    """ONE-TIME weight folding (hoisted out of the per-call path).
    Returns packed bf16 weights (4, W*CP, 3*W*CP), f32 biases (4, 1, W*CP),
    and the (N*H, 1) top/bottom border masks for the vertical taps."""
    (ea_w, ea_b, da_w, da_b), (eb_w, eb_b, db_w, db_b) = params
    ws, bs = [], []
    for w_, b_ in ((ea_w, ea_b), (db_w, db_b), (eb_w, eb_b), (da_w, da_b)):
        ws.append(_stacked_weight(w_, W))
        bs.append(_lane_bias(b_, W))
    w_all = jnp.stack(ws).astype(jnp.bfloat16)                 # (4, 128, 384)
    b_all = jnp.stack(bs)                                      # (4, 1, 128) f32
    r = jnp.arange(N * H)
    mdn = ((r % H) != 0).astype(jnp.float32)[:, None]          # zero at h == 0
    mup = ((r % H) != (H - 1)).astype(jnp.float32)[:, None]    # zero at h == H-1
    return w_all, b_all, mdn, mup


@jax.jit
def model_test_cyc_forward(x_nchw, w_all, b_all, mdn, mup):
    """x_nchw: (N, Cimg, H, W) float32 (PyTorch NCHW). Returns NCHW."""
    N, Cimg, H, W = x_nchw.shape
    WCP = W * CP

    # Layout plumbing: NCHW -> lane-dense (N*H, W*CP) with CP-padded channels.
    x = jnp.transpose(x_nchw, (0, 2, 3, 1))                    # NHWC
    x = jnp.pad(x, ((0, 0), (0, 0), (0, 0), (0, CP - Cimg)))
    x = x.reshape(N * H, WCP)

    vmem = pl.BlockSpec(memory_space=pltpu.MemorySpace.VMEM)
    out = pl.pallas_call(
        _cycle_kernel,
        out_shape=jax.ShapeDtypeStruct((N * H, WCP), jnp.float32),
        in_specs=[vmem, vmem, vmem, vmem, vmem],
        out_specs=vmem,
        input_output_aliases={0: 0},   # output shape/dtype == packed input
    )(x, mdn, mup, w_all, b_all)       # whole-problem VMEM footprint < 0.5 MiB

    out = out.reshape(N, H, W, CP)[..., :Cimg]                 # drop channel padding
    return jnp.transpose(out, (0, 3, 1, 2))                    # back to NCHW


def _reference(x_nchw, params):
    """Pure-JAX reference (lax.conv chain) for correctness checking."""
    (ea_w, ea_b, da_w, da_b), (eb_w, eb_b, db_w, db_b) = params
    dn = ("NHWC", "HWIO", "NHWC")

    def conv(x, w, b, act):
        y = jax.lax.conv_general_dilated(x, w, (1, 1), "SAME", dimension_numbers=dn)
        return act(y + b.reshape(1, 1, 1, -1))

    relu = lambda v: jnp.maximum(v, 0.0)
    x = jnp.transpose(x_nchw, (0, 2, 3, 1))
    h = conv(x, ea_w, ea_b, relu)            # gen_a.encode
    x_ab = conv(h, db_w, db_b, jnp.tanh)     # gen_b.decode
    h = conv(x_ab, eb_w, eb_b, relu)         # gen_b.encode
    x_aba = conv(h, da_w, da_b, jnp.tanh)    # gen_a.decode
    return jnp.transpose(x_aba, (0, 3, 1, 2))


if __name__ == "__main__":
    key = jax.random.PRNGKey(0)
    keys = jax.random.split(key, 9)

    N, Cimg, H, W = 2, 4, 16, 16     # input image tensor (NCHW, PyTorch convention)
    Ch = 8                           # content-encoder hidden channels

    x = jax.random.normal(keys[0], (N, Cimg, H, W), jnp.float32)

    def make_gen(k_ew, k_eb, k_dw, k_db):
        enc_w = 0.1 * jax.random.normal(k_ew, (3, 3, Cimg, Ch), jnp.float32)
        enc_b = 0.1 * jax.random.normal(k_eb, (Ch,), jnp.float32)
        dec_w = 0.1 * jax.random.normal(k_dw, (3, 3, Ch, Cimg), jnp.float32)
        dec_b = 0.1 * jax.random.normal(k_db, (Cimg,), jnp.float32)
        return (enc_w, enc_b, dec_w, dec_b)

    gen_a = make_gen(*keys[1:5])
    gen_b = make_gen(*keys[5:9])
    params = (gen_a, gen_b)

    # One-time parameter folding (not part of the per-call path).
    prepared = jax.block_until_ready(prepare_params(params, N, H, W))
    w_all, b_all, mdn, mup = prepared

    y = jax.block_until_ready(model_test_cyc_forward(x, w_all, b_all, mdn, mup))
    y_ref = jax.block_until_ready(_reference(x, params))

    assert y.shape == (N, Cimg, H, W), y.shape
    err = float(jnp.max(jnp.abs(y - y_ref)))
    # bf16 weights + bf16 MXU inputs (f32 accumulation): loosened tolerance.
    assert jnp.allclose(y, y_ref, rtol=2e-2, atol=2e-2), f"mismatch vs reference: {err}"
    print("KERNEL_OK")
</pallas_src>

<mosaic_0001>
module attributes {stable_mosaic.version = 11 : i64} {
  func.func @_cycle_kernel(%arg0: memref<32x128xf32, #tpu.memory_space<vmem>>, %arg1: memref<32x1xf32, #tpu.memory_space<vmem>>, %arg2: memref<32x1xf32, #tpu.memory_space<vmem>>, %arg3: memref<4x128x384xbf16, #tpu.memory_space<vmem>>, %arg4: memref<4x1x128xf32, #tpu.memory_space<vmem>>, %arg5: memref<32x128xf32, #tpu.memory_space<vmem>>) attributes {dimension_semantics = [], scalar_prefetch = 0 : i64, scratch_operands = 0 : i64, tpu.core_type = #tpu.core_type<tc>} {
    %c0 = arith.constant 0 : index
    %c0_0 = arith.constant 0 : index
    %0 = vector.load %arg0[%c0, %c0_0] : memref<32x128xf32, #tpu.memory_space<vmem>>, vector<32x128xf32>
    %c0_1 = arith.constant 0 : index
    %c0_2 = arith.constant 0 : index
    %1 = vector.load %arg1[%c0_1, %c0_2] : memref<32x1xf32, #tpu.memory_space<vmem>>, vector<32x1xf32>
    %c0_3 = arith.constant 0 : index
    %c0_4 = arith.constant 0 : index
    %2 = vector.load %arg2[%c0_3, %c0_4] : memref<32x1xf32, #tpu.memory_space<vmem>>, vector<32x1xf32>
    %3 = arith.truncf %0 : vector<32x128xf32> to vector<32x128xbf16>
    %c0_5 = arith.constant 0 : index
    %c0_6 = arith.constant 0 : index
    %c0_7 = arith.constant 0 : index
    %4 = vector.load %arg3[%c0_5, %c0_6, %c0_7] : memref<4x128x384xbf16, #tpu.memory_space<vmem>>, vector<1x128x384xbf16>
    %5 = vector.shape_cast %4 : vector<1x128x384xbf16> to vector<128x384xbf16>
    %cst = arith.constant dense<0.000000e+00> : vector<32x384xf32>
    %6 = tpu.matmul %3, %5, %cst {dimension_numbers = #tpu.dot_dimension_numbers<[1], [0], [0], [1], [0, 0, 1, 1], [], []>} : vector<32x128xbf16>, vector<128x384xbf16>, vector<32x384xf32> -> vector<32x384xf32>
    %7 = vector.extract_strided_slice %6 {offsets = [0, 0], sizes = [32, 128], strides = [1, 1]} : vector<32x384xf32> to vector<32x128xf32>
    %8 = vector.extract_strided_slice %6 {offsets = [0, 128], sizes = [32, 128], strides = [1, 1]} : vector<32x384xf32> to vector<32x128xf32>
    %9 = vector.extract_strided_slice %6 {offsets = [0, 256], sizes = [32, 128], strides = [1, 1]} : vector<32x384xf32> to vector<32x128xf32>
    %c1_i32 = arith.constant 1 : i32
    %10 = tpu.dynamic_rotate %7 by %c1_i32 dim 0 : vector<32x128xf32>, i32 -> vector<32x128xf32>
    %11 = vector.broadcast %1 : vector<32x1xf32> to vector<32x128xf32>
    %12 = arith.mulf %10, %11 : vector<32x128xf32>
    %13 = arith.addf %12, %8 : vector<32x128xf32>
    %c31_i32 = arith.constant 31 : i32
    %14 = tpu.dynamic_rotate %9 by %c31_i32 dim 0 : vector<32x128xf32>, i32 -> vector<32x128xf32>
    %15 = vector.broadcast %2 : vector<32x1xf32> to vector<32x128xf32>
    %16 = arith.mulf %14, %15 : vector<32x128xf32>
    %17 = arith.addf %13, %16 : vector<32x128xf32>
    %c0_8 = arith.constant 0 : index
    %c0_9 = arith.constant 0 : index
    %c0_10 = arith.constant 0 : index
    %18 = vector.load %arg4[%c0_8, %c0_9, %c0_10] : memref<4x1x128xf32, #tpu.memory_space<vmem>>, vector<1x1x128xf32>
    %19 = vector.shape_cast %18 : vector<1x1x128xf32> to vector<1x128xf32>
    %20 = vector.broadcast %19 : vector<1x128xf32> to vector<32x128xf32>
    %21 = arith.addf %17, %20 : vector<32x128xf32>
    %cst_11 = arith.constant 0.000000e+00 : f32
    %22 = vector.broadcast %cst_11 : f32 to vector<32x128xf32>
    %23 = arith.maximumf %21, %22 : vector<32x128xf32>
    %24 = arith.truncf %23 : vector<32x128xf32> to vector<32x128xbf16>
    %c1 = arith.constant 1 : index
    %c0_12 = arith.constant 0 : index
    %c0_13 = arith.constant 0 : index
    %25 = vector.load %arg3[%c1, %c0_12, %c0_13] : memref<4x128x384xbf16, #tpu.memory_space<vmem>>, vector<1x128x384xbf16>
    %26 = vector.shape_cast %25 : vector<1x128x384xbf16> to vector<128x384xbf16>
    %cst_14 = arith.constant dense<0.000000e+00> : vector<32x384xf32>
    %27 = tpu.matmul %24, %26, %cst_14 {dimension_numbers = #tpu.dot_dimension_numbers<[1], [0], [0], [1], [0, 0, 1, 1], [], []>} : vector<32x128xbf16>, vector<128x384xbf16>, vector<32x384xf32> -> vector<32x384xf32>
    %28 = vector.extract_strided_slice %27 {offsets = [0, 0], sizes = [32, 128], strides = [1, 1]} : vector<32x384xf32> to vector<32x128xf32>
    %29 = vector.extract_strided_slice %27 {offsets = [0, 128], sizes = [32, 128], strides = [1, 1]} : vector<32x384xf32> to vector<32x128xf32>
    %30 = vector.extract_strided_slice %27 {offsets = [0, 256], sizes = [32, 128], strides = [1, 1]} : vector<32x384xf32> to vector<32x128xf32>
    %c1_i32_15 = arith.constant 1 : i32
    %31 = tpu.dynamic_rotate %28 by %c1_i32_15 dim 0 : vector<32x128xf32>, i32 -> vector<32x128xf32>
    %32 = vector.broadcast %1 : vector<32x1xf32> to vector<32x128xf32>
    %33 = arith.mulf %31, %32 : vector<32x128xf32>
    %34 = arith.addf %33, %29 : vector<32x128xf32>
    %c31_i32_16 = arith.constant 31 : i32
    %35 = tpu.dynamic_rotate %30 by %c31_i32_16 dim 0 : vector<32x128xf32>, i32 -> vector<32x128xf32>
    %36 = vector.broadcast %2 : vector<32x1xf32> to vector<32x128xf32>
    %37 = arith.mulf %35, %36 : vector<32x128xf32>
    %38 = arith.addf %34, %37 : vector<32x128xf32>
    %c1_17 = arith.constant 1 : index
    %c0_18 = arith.constant 0 : index
    %c0_19 = arith.constant 0 : index
    %39 = vector.load %arg4[%c1_17, %c0_18, %c0_19] : memref<4x1x128xf32, #tpu.memory_space<vmem>>, vector<1x1x128xf32>
    %40 = vector.shape_cast %39 : vector<1x1x128xf32> to vector<1x128xf32>
    %41 = vector.broadcast %40 : vector<1x128xf32> to vector<32x128xf32>
    %42 = arith.addf %38, %41 : vector<32x128xf32>
    %43 = math.tanh %42 : vector<32x128xf32>
    %44 = arith.truncf %43 : vector<32x128xf32> to vector<32x128xbf16>
    %c2 = arith.constant 2 : index
    %c0_20 = arith.constant 0 : index
    %c0_21 = arith.constant 0 : index
    %45 = vector.load %arg3[%c2, %c0_20, %c0_21] : memref<4x128x384xbf16, #tpu.memory_space<vmem>>, vector<1x128x384xbf16>
    %46 = vector.shape_cast %45 : vector<1x128x384xbf16> to vector<128x384xbf16>
    %cst_22 = arith.constant dense<0.000000e+00> : vector<32x384xf32>
    %47 = tpu.matmul %44, %46, %cst_22 {dimension_numbers = #tpu.dot_dimension_numbers<[1], [0], [0], [1], [0, 0, 1, 1], [], []>} : vector<32x128xbf16>, vector<128x384xbf16>, vector<32x384xf32> -> vector<32x384xf32>
    %48 = vector.extract_strided_slice %47 {offsets = [0, 0], sizes = [32, 128], strides = [1, 1]} : vector<32x384xf32> to vector<32x128xf32>
    %49 = vector.extract_strided_slice %47 {offsets = [0, 128], sizes = [32, 128], strides = [1, 1]} : vector<32x384xf32> to vector<32x128xf32>
    %50 = vector.extract_strided_slice %47 {offsets = [0, 256], sizes = [32, 128], strides = [1, 1]} : vector<32x384xf32> to vector<32x128xf32>
    %c1_i32_23 = arith.constant 1 : i32
    %51 = tpu.dynamic_rotate %48 by %c1_i32_23 dim 0 : vector<32x128xf32>, i32 -> vector<32x128xf32>
    %52 = vector.broadcast %1 : vector<32x1xf32> to vector<32x128xf32>
    %53 = arith.mulf %51, %52 : vector<32x128xf32>
    %54 = arith.addf %53, %49 : vector<32x128xf32>
    %c31_i32_24 = arith.constant 31 : i32
    %55 = tpu.dynamic_rotate %50 by %c31_i32_24 dim 0 : vector<32x128xf32>, i32 -> vector<32x128xf32>
    %56 = vector.broadcast %2 : vector<32x1xf32> to vector<32x128xf32>
    %57 = arith.mulf %55, %56 : vector<32x128xf32>
    %58 = arith.addf %54, %57 : vector<32x128xf32>
    %c2_25 = arith.constant 2 : index
    %c0_26 = arith.constant 0 : index
    %c0_27 = arith.constant 0 : index
    %59 = vector.load %arg4[%c2_25, %c0_26, %c0_27] : memref<4x1x128xf32, #tpu.memory_space<vmem>>, vector<1x1x128xf32>
    %60 = vector.shape_cast %59 : vector<1x1x128xf32> to vector<1x128xf32>
    %61 = vector.broadcast %60 : vector<1x128xf32> to vector<32x128xf32>
    %62 = arith.addf %58, %61 : vector<32x128xf32>
    %cst_28 = arith.constant 0.000000e+00 : f32
    %63 = vector.broadcast %cst_28 : f32 to vector<32x128xf32>
    %64 = arith.maximumf %62, %63 : vector<32x128xf32>
    %65 = arith.truncf %64 : vector<32x128xf32> to vector<32x128xbf16>
    %c3 = arith.constant 3 : index
    %c0_29 = arith.constant 0 : index
    %c0_30 = arith.constant 0 : index
    %66 = vector.load %arg3[%c3, %c0_29, %c0_30] : memref<4x128x384xbf16, #tpu.memory_space<vmem>>, vector<1x128x384xbf16>
    %67 = vector.shape_cast %66 : vector<1x128x384xbf16> to vector<128x384xbf16>
    %cst_31 = arith.constant dense<0.000000e+00> : vector<32x384xf32>
    %68 = tpu.matmul %65, %67, %cst_31 {dimension_numbers = #tpu.dot_dimension_numbers<[1], [0], [0], [1], [0, 0, 1, 1], [], []>} : vector<32x128xbf16>, vector<128x384xbf16>, vector<32x384xf32> -> vector<32x384xf32>
    %69 = vector.extract_strided_slice %68 {offsets = [0, 0], sizes = [32, 128], strides = [1, 1]} : vector<32x384xf32> to vector<32x128xf32>
    %70 = vector.extract_strided_slice %68 {offsets = [0, 128], sizes = [32, 128], strides = [1, 1]} : vector<32x384xf32> to vector<32x128xf32>
    %71 = vector.extract_strided_slice %68 {offsets = [0, 256], sizes = [32, 128], strides = [1, 1]} : vector<32x384xf32> to vector<32x128xf32>
    %c1_i32_32 = arith.constant 1 : i32
    %72 = tpu.dynamic_rotate %69 by %c1_i32_32 dim 0 : vector<32x128xf32>, i32 -> vector<32x128xf32>
    %73 = vector.broadcast %1 : vector<32x1xf32> to vector<32x128xf32>
    %74 = arith.mulf %72, %73 : vector<32x128xf32>
    %75 = arith.addf %74, %70 : vector<32x128xf32>
    %c31_i32_33 = arith.constant 31 : i32
    %76 = tpu.dynamic_rotate %71 by %c31_i32_33 dim 0 : vector<32x128xf32>, i32 -> vector<32x128xf32>
    %77 = vector.broadcast %2 : vector<32x1xf32> to vector<32x128xf32>
    %78 = arith.mulf %76, %77 : vector<32x128xf32>
    %79 = arith.addf %75, %78 : vector<32x128xf32>
    %c3_34 = arith.constant 3 : index
    %c0_35 = arith.constant 0 : index
    %c0_36 = arith.constant 0 : index
    %80 = vector.load %arg4[%c3_34, %c0_35, %c0_36] : memref<4x1x128xf32, #tpu.memory_space<vmem>>, vector<1x1x128xf32>
    %81 = vector.shape_cast %80 : vector<1x1x128xf32> to vector<1x128xf32>
    %82 = vector.broadcast %81 : vector<1x128xf32> to vector<32x128xf32>
    %83 = arith.addf %79, %82 : vector<32x128xf32>
    %84 = math.tanh %83 : vector<32x128xf32>
    %c0_37 = arith.constant 0 : index
    %c0_38 = arith.constant 0 : index
    %85 = vector.load %arg5[%c0_37, %c0_38] : memref<32x128xf32, #tpu.memory_space<vmem>>, vector<32x128xf32>
    tpu.vector_store %arg5[%c0_37, %c0_38], %84 {strides = array<i32>} : memref<32x128xf32, #tpu.memory_space<vmem>>, vector<32x128xf32>,
    return
  }
}

</mosaic_0001>

<bundles_post_ra>
// kernel: model_test_cyc_forward.1
= control target key start
LH: loop header
LB: loop body
LE: loop exit
PB: predicated region body
PF: predicated region fallthrough
CT: control target
= control target key end

     0   :  { %v1801_v1 = vmov 0   ;;  %s2310_s3 = inlined_call_operand.vmem [shape: bf16[4,128,384], index: 3, kind: input, shape index: {}]   ;;  %s2311_s0 = inlined_call_operand.vmem [shape: f32[32,128], index: 0, kind: input, shape index: {}, may-alias: {0,5}]   ;;  %s2312_s1 = inlined_call_operand.vmem [shape: f32[32,1], index: 1, kind: input, shape index: {}]   ;;  %s2313_s2 = inlined_call_operand.vmem [shape: f32[32,1], index: 2, kind: input, shape index: {}]   ;;  %s2314_s4 = inlined_call_operand.vmem [shape: f32[4,1,128], index: 4, kind: input, shape index: {}]   ;;  %s2315_s5 = inlined_call_operand.vmem [shape: f32[32,128], index: 5, kind: output, shape index: {}, may-alias: {0,5}]  }
   0x1   :  { %v1657_v0 = vld [vmem:[%s2310_s3 + $0x4] ss:$12 sps:$4 sm:$0xff]   ;;  %227 = vmatprep.mubr.bf16.mxu0 %v1801_v1  ;;  %1655 = vset.pattern.permute.xlu0 %v1801_v1  ;;  %v1659_v2 = vld [vmem:[%s2310_s3] ss:$12 sps:$4 sm:$0xff]   ;;  %v1660_v3 = vld [vmem:[%s2310_s3 + $0x8] ss:$12 sps:$4 sm:$0xff]  }
   0x2   :  { %1656 = vset.pattern.permute.xlu1 %v1801_v1  ;;  %195 = vmatprep.subr.bf16.mxu0 %v1657_v0  ;;  %v1661_v4 = vld [vmem:[%s2310_s3 + $0x1c] ss:$12 sps:$4 sm:$0xff]   ;;  %v1663_v5 = vld [vmem:[%s2310_s3 + $0x18] ss:$12 sps:$4 sm:$0xff]   ;;  %v1664_v6 = vld [vmem:[%s2310_s3 + $0x20] ss:$12 sps:$4 sm:$0xff]   ;;  %v301_v0 = vlaneseq }
   0x3   :  { %196 = vmatpush1.bf16.msra.mxu0 %v1659_v2  ;;  %1574 = vmatprep.subr.bf16.mxu1 %v1660_v3  ;;  %v1665_v7 = vld [vmem:[%s2310_s3 + $0x34] ss:$12 sps:$4 sm:$0xff]   ;;  %v1668_v8 = vld [vmem:[%s2310_s3 + $0x38] ss:$12 sps:$4 sm:$0xff]   ;;  %v1667_v9 = vld [vmem:[%s2310_s3 + $0x30] ss:$12 sps:$4 sm:$0xff]  }
   0x4   :  { %1575 = vmatpush3.bf16.msra.mxu1 %v1660_v3  ;;  %197 = vmatprep.subr.bf16.mxu0 %v1661_v4  ;;  %v1669_v10 = vld [vmem:[%s2310_s3 + $0x4c] ss:$12 sps:$4 sm:$0xff]   ;;  %v1672_v11 = vld [vmem:[%s2310_s3 + $0x50] ss:$12 sps:$4 sm:$0xff]   ;;  %v1671_v12 = vld [vmem:[%s2310_s3 + $0x48] ss:$12 sps:$4 sm:$0xff]  }
   0x5   :  { %1576 = vmatprep.subr.bf16.mxu1 %v1664_v6  ;;  %v1673_v13 = vld [vmem:[%s2310_s3 + $0x64] ss:$12 sps:$4 sm:$0xff]   ;;  %v1676_v14 = vld [vmem:[%s2310_s3 + $0x68] ss:$12 sps:$4 sm:$0xff]   ;;  %v1675_v15 = vld [vmem:[%s2310_s3 + $0x60] ss:$12 sps:$4 sm:$0xff]  }
   0x6   :  { %v1677_v16 = vld [vmem:[%s2310_s3 + $0x7c] ss:$12 sps:$4 sm:$0xff]   ;;  %v1680_v17 = vld [vmem:[%s2310_s3 + $0x80] ss:$12 sps:$4 sm:$0xff]   ;;  %v1679_v19 = vld [vmem:[%s2310_s3 + $0x78] ss:$12 sps:$4 sm:$0xff]  }
   0x7   :  { %198 = vmatpush1.bf16.msra.mxu0 %v1663_v5  ;;  %v21_v18 = vld [vmem:[%s2311_s0] sm:$0xff]  ;;  %v22_v20 = vld [vmem:[%s2311_s0 + $0x8] sm:$0xff]  ;;  %v1683_v27 = vld [vmem:[%s2310_s3 + $0x90] ss:$12 sps:$4 sm:$0xff]   ;;  %v2021_v3 = vshrl.u32 %v301_v0, 7 }
   0x8   :  { %199 = vmatprep.subr.bf16.mxu0 %v1665_v7  ;;  %1577 = vmatpush3.bf16.msra.mxu1 %v1664_v6  ;;  %v1681_v21 = vld [vmem:[%s2310_s3 + $0x94] ss:$12 sps:$4 sm:$0xff]   ;;  %v33_v22 = vpack.c.bf16 %v22_v20, %v21_v18  ;;  %v1684_v25 = vld [vmem:[%s2310_s3 + $0x98] ss:$12 sps:$4 sm:$0xff]   ;;  %v26_v26 = vld [vmem:[%s2312_s1 + $0x8] sm:$0xff] }
   0x9   :  { %1578 = vmatprep.subr.bf16.mxu1 %v1668_v8  ;;  %v25_v23 = vld [vmem:[%s2312_s1] sm:$0xff]  ;;  %v1685_v28 = vld [vmem:[%s2310_s3 + $0xac] ss:$12 sps:$4 sm:$0xff]   ;;  %v1688_v29 = vld [vmem:[%s2310_s3 + $0xb0] ss:$12 sps:$4 sm:$0xff]   ;;  %vm303_vm0 = vcmp.lt.s32.totalorder %v2021_v3, 1 }
   0xa   :  { %v29_v24 = vld [vmem:[%s2313_s2] sm:$0xff]  ;;  %310 = vperm.xlu0 %1655, %v25_v23   ;;  %1590 = vmatprep.mubr.bf16.mxu1 %v33_v22  ;;  %v30_v30 = vld [vmem:[%s2313_s2 + $0x8] sm:$0xff]  ;;  %v27_v32 = vld [vmem:[%s2312_s1 + $0x10] sm:$0xff]  ;;  %vm340_vm1 = vcmp.lt.s32.totalorder %v2021_v3, 7 }
   0xb   :  { %200 = vmatpush1.bf16.msra.mxu0 %v1667_v9  ;;  %347 = vperm.xlu1 %1656, %v29_v24   ;;  %v1687_v31 = vld [vmem:[%s2310_s3 + $0xa8] ss:$12 sps:$4 sm:$0xff]   ;;  %v28_v33 = vld [vmem:[%s2312_s1 + $0x18] sm:$0xff]  ;;  %v1691_v36 = vld [vmem:[%s2310_s3 + $0xc4] ss:$12 sps:$4 sm:$0xff]  }
   0xc   :  { %201 = vmatprep.subr.bf16.mxu0 %v1669_v10  ;;  %1579 = vmatpush3.bf16.msra.mxu1 %v1668_v8  ;;  %v23_v34 = vld [vmem:[%s2311_s0 + $0x10] sm:$0xff]  ;;  %v24_v35 = vld [vmem:[%s2311_s0 + $0x18] sm:$0xff]  ;;  %v1689_v40 = vld [vmem:[%s2310_s3 + $0xc0] ss:$12 sps:$4 sm:$0xff]  }
   0xd   :  { %1580 = vmatprep.subr.bf16.mxu1 %v1672_v11  ;;  %v31_v37 = vld [vmem:[%s2313_s2 + $0x10] sm:$0xff]  ;;  %v32_v39 = vld [vmem:[%s2313_s2 + $0x18] sm:$0xff]  ;;  %v34_v42 = vpack.c.bf16 %v24_v35, %v23_v34  ;;  %v1696_v43 = vld [vmem:[%s2310_s3 + $0xe0] ss:$12 sps:$4 sm:$0xff]  }
   0xe   :  { %315 = vperm.xlu0 %1655, %v26_v26   ;;  %v1692_v38 = vld [vmem:[%s2310_s3 + $0xc8] ss:$12 sps:$4 sm:$0xff]   ;;  %v1693_v44 = vld [vmem:[%s2310_s3 + $0xd8] ss:$12 sps:$4 sm:$0xff]   ;;  %v1697_v46 = vld [vmem:[%s2310_s3 + $0xf0] ss:$12 sps:$4 sm:$0xff]  }
   0xf   :  { %202 = vmatpush1.bf16.msra.mxu0 %v1671_v12  ;;  %352 = vperm.xlu1 %1656, %v30_v30   ;;  %v1695_v41 = vld [vmem:[%s2310_s3 + $0xdc] ss:$12 sps:$4 sm:$0xff]   ;;  %v1699_v45 = vld [vmem:[%s2310_s3 + $0xf4] ss:$12 sps:$4 sm:$0xff]   ;;  %v1700_v47 = vld [vmem:[%s2310_s3 + $0xf8] ss:$12 sps:$4 sm:$0xff]  }
  0x10   :  { %203 = vmatprep.subr.bf16.mxu0 %v1673_v13  ;;  %1581 = vmatpush3.bf16.msra.mxu1 %v1672_v11  ;;  %v1703_v48 = vld [vmem:[%s2310_s3 + $0x10c] ss:$12 sps:$4 sm:$0xff]   ;;  %v1701_v49 = vld [vmem:[%s2310_s3 + $0x108] ss:$12 sps:$4 sm:$0xff]   ;;  %v1704_v50 = vld [vmem:[%s2310_s3 + $0x110] ss:$12 sps:$4 sm:$0xff]  }
  0x11   :  { %1582 = vmatprep.subr.bf16.mxu1 %v1676_v14  ;;  %v1707_v51 = vld [vmem:[%s2310_s3 + $0x124] ss:$12 sps:$4 sm:$0xff]   ;;  %v1705_v52 = vld [vmem:[%s2310_s3 + $0x120] ss:$12 sps:$4 sm:$0xff]   ;;  %v1708_v53 = vld [vmem:[%s2310_s3 + $0x128] ss:$12 sps:$4 sm:$0xff]  }
  0x12   :  { %320 = vperm.xlu0 %1655, %v27_v32   ;;  %v1711_v54 = vld [vmem:[%s2310_s3 + $0x13c] ss:$12 sps:$4 sm:$0xff]   ;;  %v1709_v55 = vld [vmem:[%s2310_s3 + $0x138] ss:$12 sps:$4 sm:$0xff]   ;;  %v1712_v56 = vld [vmem:[%s2310_s3 + $0x140] ss:$12 sps:$4 sm:$0xff]  }
  0x13   :  { %204 = vmatpush1.bf16.msra.mxu0 %v1675_v15  ;;  %325 = vperm.xlu1 %1656, %v28_v33   ;;  %v1715_v57 = vld [vmem:[%s2310_s3 + $0x154] ss:$12 sps:$4 sm:$0xff]   ;;  %v1713_v58 = vld [vmem:[%s2310_s3 + $0x150] ss:$12 sps:$4 sm:$0xff]   ;;  %v1716_v59 = vld [vmem:[%s2310_s3 + $0x158] ss:$12 sps:$4 sm:$0xff]  }
  0x14   :  { %205 = vmatprep.subr.bf16.mxu0 %v1677_v16  ;;  %1583 = vmatpush3.bf16.msra.mxu1 %v1676_v14  ;;  %v1719_v60 = vld [vmem:[%s2310_s3 + $0x16c] ss:$12 sps:$4 sm:$0xff]   ;;  %v1717_v61 = vld [vmem:[%s2310_s3 + $0x168] ss:$12 sps:$4 sm:$0xff]   ;;  %v1720_v62 = vld [vmem:[%s2310_s3 + $0x170] ss:$12 sps:$4 sm:$0xff]  }
  0x15   :  { %1584 = vmatprep.subr.bf16.mxu1 %v1680_v17 }
  0x16   :  { %357 = vperm.xlu0 %1655, %v31_v37  }
  0x17   :  { %206 = vmatpush1.bf16.msra.mxu0 %v1679_v19  ;;  %362 = vperm.xlu1 %1656, %v32_v39  }
  0x18   :  { %207 = vmatprep.subr.bf16.mxu0 %v1681_v21  ;;  %1585 = vmatpush3.bf16.msra.mxu1 %v1680_v17 }
  0x19   :  { %1586 = vmatprep.subr.bf16.mxu1 %v1684_v25 }
  0x1b   :  { %208 = vmatpush1.bf16.msra.mxu0 %v1683_v27 }
  0x1c   :  { %209 = vmatprep.subr.bf16.mxu0 %v1685_v28  ;;  %1587 = vmatpush3.bf16.msra.mxu1 %v1684_v25 }
  0x1d   :  { %1588 = vmatprep.subr.bf16.mxu1 %v1688_v29 }
  0x1f   :  { %210 = vmatpush1.bf16.msra.mxu0 %v1687_v31 }
  0x20   :  { %551 = vmatprep.subr.bf16.mxu0 %v1691_v36  ;;  %1589 = vmatpush3.bf16.msra.mxu1 %v1688_v29 }
  0x21   :  { %1594 = vmatprep.subr.bf16.mxu1 %v1692_v38 }
  0x22   :  { %228 = vmatmul.mubr.bf16.vlgmr.msra.gmra.mrb[0].mxu0 %v33_v22 }
  0x23   :  { %237 = vmatprep.mubr.bf16.mxu0 %v1801_v1  ;;  %1591 = vmatmul.mubr.bf16.vlgmr.msra.gmra.mrb[0].mxu1 %v34_v42 }
  0x24   :  { %552 = vmatpush1.bf16.msra.mxu0 %v1689_v40  ;;  %1595 = vmatpush3.bf16.msra.mxu1 %v1692_v38 }
  0x25   :  { %553 = vmatprep.subr.bf16.mxu0 %v1695_v41  ;;  %1596 = vmatprep.subr.bf16.mxu1 %v1696_v43 }
  0x28   :  { %554 = vmatpush1.bf16.msra.mxu0 %v1693_v44  ;;  %1597 = vmatpush3.bf16.msra.mxu1 %v1696_v43 }
  0x29   :  { %555 = vmatprep.subr.bf16.mxu0 %v1699_v45  ;;  %1598 = vmatprep.subr.bf16.mxu1 %v1700_v47 }
  0x2a   :  { %238 = vmatmul.mubr.bf16.gmra.mrb[4].mxu0 %v34_v42 }
  0x2b   :  { %583 = vmatprep.mubr.bf16.mxu0 %v1801_v1 }
  0x2c   :  { %556 = vmatpush1.bf16.msra.mxu0 %v1697_v46  ;;  %1599 = vmatpush3.bf16.msra.mxu1 %v1700_v47 }
  0x2d   :  { %557 = vmatprep.subr.bf16.mxu0 %v1703_v48  ;;  %1600 = vmatprep.subr.bf16.mxu1 %v1704_v50  ;;  %v1359_v48 = vld [vmem:[%s2314_s4] ss:$0 sm:$0xff] }
  0x30   :  { %558 = vmatpush1.bf16.msra.mxu0 %v1701_v49  ;;  %1601 = vmatpush3.bf16.msra.mxu1 %v1704_v50 }
  0x31   :  { %559 = vmatprep.subr.bf16.mxu0 %v1707_v51  ;;  %1602 = vmatprep.subr.bf16.mxu1 %v1708_v53 }
  0x34   :  { %560 = vmatpush1.bf16.msra.mxu0 %v1705_v52  ;;  %1603 = vmatpush3.bf16.msra.mxu1 %v1708_v53 }
  0x35   :  { %561 = vmatprep.subr.bf16.mxu0 %v1711_v54  ;;  %1604 = vmatprep.subr.bf16.mxu1 %v1712_v56 }
  0x38   :  { %562 = vmatpush1.bf16.msra.mxu0 %v1709_v55  ;;  %1605 = vmatpush3.bf16.msra.mxu1 %v1712_v56 }
  0x39   :  { %563 = vmatprep.subr.bf16.mxu0 %v1715_v57  ;;  %1606 = vmatprep.subr.bf16.mxu1 %v1716_v59 }
  0x3c   :  { %564 = vmatpush1.bf16.msra.mxu0 %v1713_v58  ;;  %1607 = vmatpush3.bf16.msra.mxu1 %v1716_v59 }
  0x3d   :  { %565 = vmatprep.subr.bf16.mxu0 %v1719_v60  ;;  %1608 = vmatprep.subr.bf16.mxu1 %v1720_v62 }
  0x40   :  { %566 = vmatpush1.bf16.msra.mxu0 %v1717_v61  ;;  %1609 = vmatpush3.bf16.msra.mxu1 %v1720_v62 }
  0x89   :  { %v2017_v63 = vpop.permute.xlu0 %310 }
  0x8a   :  { %v2019_v2 = vpop.permute.xlu1 %347 }
  0x8d   :  { %v2023_v4 = vpop.permute.xlu0 %315 }
  0x8e   :  { %v2025_v7 = vpop.permute.xlu1 %352 }
  0x91   :  { %v2031_v20 = vpop.permute.xlu0 %320 }
  0x92   :  { %v2034_v23 = vpop.permute.xlu1 %325 }
  0x95   :  { %v2045_v35 = vpop.permute.xlu0 %357 }
  0x96   :  { %v2052_v41 = vpop.permute.xlu1 %362 }
  0xf5   :  { %v229_v5 = vpop.f32.mrb[0].mxu0 }
  0xf6   :  { %v231_v6 = vpop.f32.mrb[1].mxu0  ;;  %v1592_v8 = vpop.f32.mrb[0].mxu1  ;;  %v297_v10 = vrot.slane %v229_v5, 7 }
  0xf7   :  { %v233_v9 = vpop.f32.mrb[2].mxu0  ;;  %v282_v12 = vpop.f32.mrb[1].mxu1  ;;  %v338_v14 = vrot.slane %v1592_v8, 1  ;;  %v1721_v8 = vld [vmem:[%s2310_s3 + $0x180] ss:$12 sps:$4 sm:$0xff]  }
  0xf8   :  { %v298_v11 = vrot.slane %v233_v9, 7  ;;  %v235_v13 = vpop.f32.mrb[3].mxu0  ;;  %v336_v15 = vrot.slane %v282_v12, 1  ;;  %v1593_v16 = vpop.f32.mrb[2].mxu1  ;;  %v1724_v9 = vld [vmem:[%s2310_s3 + $0x188] ss:$12 sps:$4 sm:$0xff]  }
  0xf9   :  { %v339_v18 = vrot.slane %v1593_v16, 1  ;;  %v285_v19 = vpop.f32.mrb[3].mxu1  ;;  %1614 = vmatprep.subr.bf16.mxu1 %v1724_v9  ;;  %v1728_v12 = vld [vmem:[%s2310_s3 + $0x1a0] ss:$12 sps:$4 sm:$0xff]  }
  0xfa   :  { %v306_v17 = vsel %vm303_vm0, %v297_v10, %v298_v11  ;;  %v337_v22 = vrot.slane %v285_v19, 1  ;;  %v1735_v16 = vld [vmem:[%s2310_s3 + $0x1cc] ss:$12 sps:$4 sm:$0xff]   ;;  %v1739_v19 = vld [vmem:[%s2310_s3 + $0x1e4] ss:$12 sps:$4 sm:$0xff]  }
  0xfb   :  { %v329_v21 = vmul.f32 %v2023_v4, %v306_v17  ;;  %v341_v24 = vsel %vm340_vm1, %v338_v14, %v339_v18  ;;  %v344_v25 = vsel %vm340_vm1, %v339_v18, %v336_v15  ;;  %v1733_v17 = vld [vmem:[%s2310_s3 + $0x1c8] ss:$12 sps:$4 sm:$0xff]   ;;  %v1736_v18 = vld [vmem:[%s2310_s3 + $0x1d0] ss:$12 sps:$4 sm:$0xff]  }
  0xfc   :  { %v342_v27 = vsel %vm340_vm1, %v337_v22, %v338_v14  ;;  %v343_v28 = vsel %vm340_vm1, %v336_v15, %v337_v22  ;;  %v367_v43 = vmul.f32 %v2045_v35, %v341_v24  ;;  %v368_v51 = vmul.f32 %v2052_v41, %v344_v25  ;;  %v1729_v14 = vld [vmem:[%s2310_s3 + $0x1b0] ss:$12 sps:$4 sm:$0xff]   ;;  %v1732_v15 = vld [vmem:[%s2310_s3 + $0x1b8] ss:$12 sps:$4 sm:$0xff]   ;;  %v1740_v22 = vld [vmem:[%s2310_s3 + $0x1e8] ss:$12 sps:$4 sm:$0xff]  }
  0xfd   :  { %v333_v26 = vadd.f32 %v329_v21, %v235_v13  ;;  %v239_v29 = vpop.f32.mrb[4].mxu0  ;;  %v366_v30 = vmul.f32 %v2025_v7, %v342_v27  ;;  %v365_v47 = vmul.f32 %v2019_v2, %v343_v28  ;;  %v1731_v13 = vld [vmem:[%s2310_s3 + $0x1b4] ss:$12 sps:$4 sm:$0xff]   ;;  %v1743_v24 = vld [vmem:[%s2310_s3 + $0x1fc] ss:$12 sps:$4 sm:$0xff]  }
  0xfe   :  { %v299_v31 = vrot.slane %v239_v29, 7  ;;  %v241_v32 = vpop.f32.mrb[5].mxu0  ;;  %v1737_v21 = vld [vmem:[%s2310_s3 + $0x1e0] ss:$12 sps:$4 sm:$0xff]   ;;  %v1741_v25 = vld [vmem:[%s2310_s3 + $0x1f8] ss:$12 sps:$4 sm:$0xff]  }
  0xff   :  { %v243_v33 = vpop.f32.mrb[6].mxu0  ;;  %v370_v34 = vadd.f32 %v366_v30, %v333_v26  ;;  %v1744_v26 = vld [vmem:[%s2310_s3 + $0x200] ss:$12 sps:$4 sm:$0xff]   ;;  %v1748_v28 = vld [vmem:[%s2310_s3 + $0x218] ss:$12 sps:$4 sm:$0xff]  }
 0x100   :  { %v305_v36 = vsel %vm303_vm0, %v298_v11, %v299_v31  ;;  %v300_v37 = vrot.slane %v243_v33, 7  ;;  %v245_v38 = vpop.f32.mrb[7].mxu0  ;;  %v1725_v11 = vld [vmem:[%s2310_s3 + $0x198] ss:$12 sps:$4 sm:$0xff]   ;;  %v1747_v27 = vld [vmem:[%s2310_s3 + $0x214] ss:$12 sps:$4 sm:$0xff]  }
 0x101   :  { %v330_v39 = vmul.f32 %v2031_v20, %v305_v36  ;;  %v381_v53 = vadd.f32 %v1359_v48, %v370_v34  ;;  %v1745_v29 = vld [vmem:[%s2310_s3 + $0x210] ss:$12 sps:$4 sm:$0xff]   ;;  %v1751_v30 = vld [vmem:[%s2310_s3 + $0x22c] ss:$12 sps:$4 sm:$0xff]   ;;  %v2144_v34 = vld [vmem:[%s2310_s3 + $0x248] ss:$12 sps:$4 sm:$0xff]  }
 0x102   :  { %v307_v40 = vsel %vm303_vm0, %v300_v37, %v297_v10  ;;  %v304_v42 = vsel %vm303_vm0, %v299_v31, %v300_v37  ;;  %v1727_v10 = vld [vmem:[%s2310_s3 + $0x19c] ss:$12 sps:$4 sm:$0xff]   ;;  %v1755_v33 = vld [vmem:[%s2310_s3 + $0x244] ss:$12 sps:$4 sm:$0xff]  }
 0x103   :  { %v334_v44 = vadd.f32 %v330_v39, %v241_v32  ;;  %v328_v45 = vmul.f32 %v2017_v63, %v307_v40  ;;  %v331_v46 = vmul.f32 %v2034_v23, %v304_v42  ;;  %v385_v59 = vmax.f32 %v381_v53, 0.0  ;;  %v1752_v31 = vld [vmem:[%s2310_s3 + $0x230] ss:$12 sps:$4 sm:$0xff]   ;;  %v1749_v32 = vld [vmem:[%s2310_s3 + $0x228] ss:$12 sps:$4 sm:$0xff]  }
 0x105   :  { %v371_v49 = vadd.f32 %v367_v43, %v334_v44  ;;  %v332_v50 = vadd.f32 %v328_v45, %v231_v6  ;;  %v335_v52 = vadd.f32 %v331_v46, %v245_v38  ;;  %v1723_v6 = vld [vmem:[%s2310_s3 + $0x184] ss:$12 sps:$4 sm:$0xff]  }
 0x106   :  { %864 = vmatprep.subr.bf16.mxu0 %v1723_v6 }
 0x107   :  { %v382_v54 = vadd.f32 %v1359_v48, %v371_v49  ;;  %v369_v55 = vadd.f32 %v365_v47, %v332_v50  ;;  %v372_v56 = vadd.f32 %v368_v51, %v335_v52 }
 0x109   :  { %v380_v57 = vadd.f32 %v1359_v48, %v369_v55  ;;  %v383_v58 = vadd.f32 %v1359_v48, %v372_v56  ;;  %v386_v60 = vmax.f32 %v382_v54, 0.0 }
 0x10b   :  { %v384_v61 = vmax.f32 %v380_v57, 0.0  ;;  %v387_v62 = vmax.f32 %v383_v58, 0.0 }
 0x10d   :  { %v389_v0 = vpack.c.bf16 %v387_v62, %v386_v60  ;;  %v388_v5 = vpack.c.bf16 %v385_v59, %v384_v61 }
 0x10f   :  { %584 = vmatmul.mubr.bf16.vlgmr.msra.gmra.mrb[8].mxu0 %v388_v5  ;;  %1610 = vmatprep.mubr.bf16.mxu1 %v388_v5 }
 0x110   :  { %1611 = vmatmul.mubr.bf16.vlgmr.msra.gmra.mrb[4].mxu1 %v389_v0  ;;  %593 = vmatprep.mubr.bf16.mxu0 %v1801_v1 }
 0x111   :  { %865 = vmatpush1.bf16.msra.mxu0 %v1721_v8  ;;  %1615 = vmatpush3.bf16.msra.mxu1 %v1724_v9 }
 0x112   :  { %866 = vmatprep.subr.bf16.mxu0 %v1727_v10  ;;  %1616 = vmatprep.subr.bf16.mxu1 %v1728_v12  ;;  %v1417_v10 = vld [vmem:[%s2314_s4 + $0x1] ss:$0 sm:$0xff] }
 0x115   :  { %867 = vmatpush1.bf16.msra.mxu0 %v1725_v11  ;;  %1617 = vmatpush3.bf16.msra.mxu1 %v1728_v12 }
 0x116   :  { %868 = vmatprep.subr.bf16.mxu0 %v1731_v13  ;;  %1618 = vmatprep.subr.bf16.mxu1 %v1732_v15 }
 0x117   :  { %594 = vmatmul.mubr.bf16.gmra.mrb[12].mxu0 %v389_v0 }
 0x118   :  { %896 = vmatprep.mubr.bf16.mxu0 %v1801_v1 }
 0x119   :  { %869 = vmatpush1.bf16.msra.mxu0 %v1729_v14  ;;  %1619 = vmatpush3.bf16.msra.mxu1 %v1732_v15 }
 0x11a   :  { %870 = vmatprep.subr.bf16.mxu0 %v1735_v16  ;;  %1620 = vmatprep.subr.bf16.mxu1 %v1736_v18 }
 0x11d   :  { %871 = vmatpush1.bf16.msra.mxu0 %v1733_v17  ;;  %1621 = vmatpush3.bf16.msra.mxu1 %v1736_v18 }
 0x11e   :  { %872 = vmatprep.subr.bf16.mxu0 %v1739_v19  ;;  %1622 = vmatprep.subr.bf16.mxu1 %v1740_v22 }
 0x121   :  { %873 = vmatpush1.bf16.msra.mxu0 %v1737_v21  ;;  %1623 = vmatpush3.bf16.msra.mxu1 %v1740_v22 }
 0x122   :  { %874 = vmatprep.subr.bf16.mxu0 %v1743_v24  ;;  %1624 = vmatprep.subr.bf16.mxu1 %v1744_v26 }
 0x125   :  { %875 = vmatpush1.bf16.msra.mxu0 %v1741_v25  ;;  %1625 = vmatpush3.bf16.msra.mxu1 %v1744_v26 }
 0x126   :  { %876 = vmatprep.subr.bf16.mxu0 %v1747_v27  ;;  %1626 = vmatprep.subr.bf16.mxu1 %v1748_v28 }
 0x129   :  { %877 = vmatpush1.bf16.msra.mxu0 %v1745_v29  ;;  %1627 = vmatpush3.bf16.msra.mxu1 %v1748_v28 }
 0x12a   :  { %878 = vmatprep.subr.bf16.mxu0 %v1751_v30  ;;  %1628 = vmatprep.subr.bf16.mxu1 %v1752_v31 }
 0x12d   :  { %879 = vmatpush1.bf16.msra.mxu0 %v1749_v32  ;;  %1629 = vmatpush3.bf16.msra.mxu1 %v1752_v31 }
 0x12e   :  { %1177 = vmatprep.subr.bf16.mxu0 %v1755_v33  ;;  %1634 = vmatprep.subr.bf16.mxu1 %v2144_v34 }
 0x1e2   :  { %v585_v36 = vpop.f32.mrb[8].mxu0 }
 0x1e3   :  { %v587_v37 = vpop.f32.mrb[9].mxu0  ;;  %v1612_v38 = vpop.f32.mrb[4].mxu1  ;;  %v653_v42 = vrot.slane %v585_v36, 7 }
 0x1e4   :  { %v589_v39 = vpop.f32.mrb[10].mxu0  ;;  %v638_v40 = vpop.f32.mrb[5].mxu1  ;;  %v671_v47 = vrot.slane %v1612_v38, 1  ;;  %v1753_v38 = vld [vmem:[%s2310_s3 + $0x240] ss:$12 sps:$4 sm:$0xff]  }
 0x1e5   :  { %v654_v43 = vrot.slane %v589_v39, 7  ;;  %v669_v44 = vrot.slane %v638_v40, 1  ;;  %v591_v45 = vpop.f32.mrb[11].mxu0  ;;  %v1613_v46 = vpop.f32.mrb[6].mxu1  ;;  %v1759_v39 = vld [vmem:[%s2310_s3 + $0x25c] ss:$12 sps:$4 sm:$0xff]  }
 0x1e6   :  { %v672_v48 = vrot.slane %v1613_v46, 1  ;;  %v641_v49 = vpop.f32.mrb[7].mxu1  ;;  %v1760_v40 = vld [vmem:[%s2310_s3 + $0x260] ss:$12 sps:$4 sm:$0xff]   ;;  %v1765_v46 = vld [vmem:[%s2310_s3 + $0x288] ss:$12 sps:$4 sm:$0xff]  }
 0x1e7   :  { %v659_v50 = vsel %vm303_vm0, %v653_v42, %v654_v43  ;;  %v670_v51 = vrot.slane %v641_v49, 1  ;;  %v1769_v49 = vld [vmem:[%s2310_s3 + $0x2a0] ss:$12 sps:$4 sm:$0xff]  }
 0x1e8   :  { %v662_v52 = vmul.f32 %v659_v50, %v2023_v4  ;;  %v673_v53 = vsel %vm340_vm1, %v671_v47, %v672_v48  ;;  %v676_v54 = vsel %vm340_vm1, %v672_v48, %v669_v44  ;;  %v1771_v48 = vld [vmem:[%s2310_s3 + $0x2a4] ss:$12 sps:$4 sm:$0xff]   ;;  %v1772_v50 = vld [vmem:[%s2310_s3 + $0x2a8] ss:$12 sps:$4 sm:$0xff]  }
 0x1e9   :  { %v674_v55 = vsel %vm340_vm1, %v670_v51, %v671_v47  ;;  %v675_v56 = vsel %vm340_vm1, %v669_v44, %v670_v51  ;;  %v679_v14 = vmul.f32 %v673_v53, %v2045_v35  ;;  %v680_v18 = vmul.f32 %v676_v54, %v2052_v41  ;;  %v1761_v44 = vld [vmem:[%s2310_s3 + $0x270] ss:$12 sps:$4 sm:$0xff]   ;;  %v1776_v53 = vld [vmem:[%s2310_s3 + $0x2c0] ss:$12 sps:$4 sm:$0xff]  }
 0x1ea   :  { %v666_v57 = vadd.f32 %v662_v52, %v591_v45  ;;  %v678_v58 = vmul.f32 %v674_v55, %v2025_v7  ;;  %v595_v59 = vpop.f32.mrb[12].mxu0  ;;  %v677_v17 = vmul.f32 %v675_v56, %v2019_v2  ;;  %v1767_v45 = vld [vmem:[%s2310_s3 + $0x28c] ss:$12 sps:$4 sm:$0xff]   ;;  %v1768_v47 = vld [vmem:[%s2310_s3 + $0x290] ss:$12 sps:$4 sm:$0xff]  }
 0x1eb   :  { %v655_v60 = vrot.slane %v595_v59, 7  ;;  %v597_v61 = vpop.f32.mrb[13].mxu0  ;;  %v1775_v51 = vld [vmem:[%s2310_s3 + $0x2bc] ss:$12 sps:$4 sm:$0xff]   ;;  %v1773_v52 = vld [vmem:[%s2310_s3 + $0x2b8] ss:$12 sps:$4 sm:$0xff]  }
 0x1ec   :  { %v682_v62 = vadd.f32 %v678_v58, %v666_v57  ;;  %v599_v0 = vpop.f32.mrb[14].mxu0  ;;  %v1779_v54 = vld [vmem:[%s2310_s3 + $0x2d4] ss:$12 sps:$4 sm:$0xff]   ;;  %v1777_v55 = vld [vmem:[%s2310_s3 + $0x2d0] ss:$12 sps:$4 sm:$0xff]  }
 0x1ed   :  { %v658_v5 = vsel %vm303_vm0, %v654_v43, %v655_v60  ;;  %v656_v6 = vrot.slane %v599_v0, 7  ;;  %v601_v8 = vpop.f32.mrb[15].mxu0  ;;  %v1763_v43 = vld [vmem:[%s2310_s3 + $0x274] ss:$12 sps:$4 sm:$0xff]   ;;  %v1780_v56 = vld [vmem:[%s2310_s3 + $0x2d8] ss:$12 sps:$4 sm:$0xff]  }
 0x1ee   :  { %v663_v9 = vmul.f32 %v658_v5, %v2031_v20  ;;  %v694_v21 = vadd.f32 %v1417_v10, %v682_v62  ;;  %v1783_v57 = vld [vmem:[%s2310_s3 + $0x2ec] ss:$12 sps:$4 sm:$0xff]   ;;  %v1781_v58 = vld [vmem:[%s2310_s3 + $0x2e8] ss:$12 sps:$4 sm:$0xff]   ;;  %v1784_v59 = vld [vmem:[%s2310_s3 + $0x2f0] ss:$12 sps:$4 sm:$0xff]  }
 0x1ef   :  { %v660_v11 = vsel %vm303_vm0, %v656_v6, %v653_v42  ;;  %v657_v12 = vsel %vm303_vm0, %v655_v60, %v656_v6  ;;  %v1757_v42 = vld [vmem:[%s2310_s3 + $0x258] ss:$12 sps:$4 sm:$0xff]  }
 0x1f0   :  { %v667_v13 = vadd.f32 %v663_v9, %v597_v61  ;;  %v661_v15 = vmul.f32 %v660_v11, %v2017_v63  ;;  %v664_v16 = vmul.f32 %v657_v12, %v2034_v23  ;;  %1785 = vtanh.f32 %v694_v21 }
 0x1f2   :  { %v683_v19 = vadd.f32 %v679_v14, %v667_v13  ;;  %v665_v22 = vadd.f32 %v661_v15, %v587_v37  ;;  %v668_v24 = vadd.f32 %v664_v16, %v601_v8 }
 0x1f4   :  { %v695_v25 = vadd.f32 %v1417_v10, %v683_v19  ;;  %v681_v26 = vadd.f32 %v677_v17, %v665_v22  ;;  %v684_v27 = vadd.f32 %v680_v18, %v668_v24 }
 0x1f6   :  { %v693_v28 = vadd.f32 %v1417_v10, %v681_v26  ;;  %v696_v29 = vadd.f32 %v1417_v10, %v684_v27  ;;  %1787 = vtanh.f32 %v695_v25 }
 0x1f8   :  { %1789 = vtanh.f32 %v693_v28 }
 0x1f9   :  { %1791 = vtanh.f32 %v696_v29 }
 0x1fa   :  { %v1786_v30 = vpop.eup %1785 }
 0x200   :  { %v1788_v31 = vpop.eup %1787 }
 0x202   :  { %v1790_v32 = vpop.eup %1789 }
 0x203   :  { %v1792_v33 = vpop.eup %1791  ;;  %v701_v36 = vpack.c.bf16 %v1786_v30, %v1790_v32 }
 0x204   :  { %v702_v37 = vpack.c.bf16 %v1792_v33, %v1788_v31 }
 0x205   :  { %897 = vmatmul.mubr.bf16.vlgmr.msra.gmra.mrb[16].mxu0 %v701_v36  ;;  %1630 = vmatprep.mubr.bf16.mxu1 %v701_v36 }
 0x206   :  { %1631 = vmatmul.mubr.bf16.vlgmr.msra.gmra.mrb[8].mxu1 %v702_v37  ;;  %906 = vmatprep.mubr.bf16.mxu0 %v1801_v1 }
 0x207   :  { %1178 = vmatpush1.bf16.msra.mxu0 %v1753_v38  ;;  %1635 = vmatpush3.bf16.msra.mxu1 %v2144_v34  ;;  %v1764_v34 = vld [vmem:[%s2310_s3 + $0x278] ss:$12 sps:$4 sm:$0xff]  }
 0x208   :  { %1179 = vmatprep.subr.bf16.mxu0 %v1759_v39  ;;  %1636 = vmatprep.subr.bf16.mxu1 %v1760_v40 }
 0x20b   :  { %1180 = vmatpush1.bf16.msra.mxu0 %v1757_v42  ;;  %1637 = vmatpush3.bf16.msra.mxu1 %v1760_v40 }
 0x20c   :  { %1181 = vmatprep.subr.bf16.mxu0 %v1763_v43  ;;  %1638 = vmatprep.subr.bf16.mxu1 %v1764_v34 }
 0x20d   :  { %907 = vmatmul.mubr.bf16.gmra.mrb[20].mxu0 %v702_v37 }
 0x20e   :  { %1209 = vmatprep.mubr.bf16.mxu0 %v1801_v1 }
 0x20f   :  { %1182 = vmatpush1.bf16.msra.mxu0 %v1761_v44  ;;  %1639 = vmatpush3.bf16.msra.mxu1 %v1764_v34  ;;  %v1475_v44 = vld [vmem:[%s2314_s4 + $0x2] ss:$0 sm:$0xff] }
 0x210   :  { %1183 = vmatprep.subr.bf16.mxu0 %v1767_v45  ;;  %1640 = vmatprep.subr.bf16.mxu1 %v1768_v47 }
 0x213   :  { %1184 = vmatpush1.bf16.msra.mxu0 %v1765_v46  ;;  %1641 = vmatpush3.bf16.msra.mxu1 %v1768_v47 }
 0x214   :  { %1185 = vmatprep.subr.bf16.mxu0 %v1771_v48  ;;  %1642 = vmatprep.subr.bf16.mxu1 %v1772_v50 }
 0x217   :  { %1186 = vmatpush1.bf16.msra.mxu0 %v1769_v49  ;;  %1643 = vmatpush3.bf16.msra.mxu1 %v1772_v50 }
 0x218   :  { %1187 = vmatprep.subr.bf16.mxu0 %v1775_v51  ;;  %1644 = vmatprep.subr.bf16.mxu1 %v1776_v53 }
 0x21b   :  { %1188 = vmatpush1.bf16.msra.mxu0 %v1773_v52  ;;  %1645 = vmatpush3.bf16.msra.mxu1 %v1776_v53 }
 0x21c   :  { %1189 = vmatprep.subr.bf16.mxu0 %v1779_v54  ;;  %1646 = vmatprep.subr.bf16.mxu1 %v1780_v56 }
 0x21f   :  { %1190 = vmatpush1.bf16.msra.mxu0 %v1777_v55  ;;  %1647 = vmatpush3.bf16.msra.mxu1 %v1780_v56 }
 0x220   :  { %1191 = vmatprep.subr.bf16.mxu0 %v1783_v57  ;;  %1648 = vmatprep.subr.bf16.mxu1 %v1784_v59 }
 0x223   :  { %1192 = vmatpush1.bf16.msra.mxu0 %v1781_v58  ;;  %1649 = vmatpush3.bf16.msra.mxu1 %v1784_v59 }
 0x2d8   :  { %v898_v60 = vpop.f32.mrb[16].mxu0 }
 0x2d9   :  { %v900_v61 = vpop.f32.mrb[17].mxu0  ;;  %v1632_v62 = vpop.f32.mrb[8].mxu1  ;;  %v966_v6 = vrot.slane %v898_v60, 7 }
 0x2da   :  { %v902_v0 = vpop.f32.mrb[18].mxu0  ;;  %v951_v5 = vpop.f32.mrb[9].mxu1  ;;  %v984_v12 = vrot.slane %v1632_v62, 1 }
 0x2db   :  { %v967_v8 = vrot.slane %v902_v0, 7  ;;  %v982_v9 = vrot.slane %v951_v5, 1  ;;  %v904_v10 = vpop.f32.mrb[19].mxu0  ;;  %v1633_v11 = vpop.f32.mrb[10].mxu1 }
 0x2dc   :  { %v985_v13 = vrot.slane %v1633_v11, 1  ;;  %v954_v14 = vpop.f32.mrb[11].mxu1 }
 0x2dd   :  { %v972_v15 = vsel %vm303_vm0, %v966_v6, %v967_v8  ;;  %v983_v16 = vrot.slane %v954_v14, 1 }
 0x2de   :  { %v975_v17 = vmul.f32 %v972_v15, %v2023_v4  ;;  %v986_v18 = vsel %vm340_vm1, %v984_v12, %v985_v13  ;;  %v989_v19 = vsel %vm340_vm1, %v985_v13, %v982_v9 }
 0x2df   :  { %v987_v21 = vsel %vm340_vm1, %v983_v16, %v984_v12  ;;  %v988_v22 = vsel %vm340_vm1, %v982_v9, %v983_v16  ;;  %v992_v40 = vmul.f32 %v986_v18, %v2045_v35  ;;  %v993_v34 = vmul.f32 %v989_v19, %v2052_v41 }
 0x2e0   :  { %v979_v24 = vadd.f32 %v975_v17, %v904_v10  ;;  %v991_v25 = vmul.f32 %v987_v21, %v2025_v7  ;;  %v908_v26 = vpop.f32.mrb[20].mxu0  ;;  %v990_v45 = vmul.f32 %v988_v22, %v2019_v2 }
 0x2e1   :  { %v968_v27 = vrot.slane %v908_v26, 7  ;;  %v910_v28 = vpop.f32.mrb[21].mxu0 }
 0x2e2   :  { %v995_v29 = vadd.f32 %v991_v25, %v979_v24  ;;  %v912_v30 = vpop.f32.mrb[22].mxu0 }
 0x2e3   :  { %v971_v31 = vsel %vm303_vm0, %v967_v8, %v968_v27  ;;  %v969_v32 = vrot.slane %v912_v30, 7  ;;  %v914_v33 = vpop.f32.mrb[23].mxu0 }
 0x2e4   :  { %v976_v36 = vmul.f32 %v971_v31, %v2031_v20  ;;  %v1007_v49 = vadd.f32 %v1475_v44, %v995_v29 }
 0x2e5   :  { %v973_v38 = vsel %vm303_vm0, %v969_v32, %v966_v6  ;;  %v970_v37 = vsel %vm303_vm0, %v968_v27, %v969_v32 }
 0x2e6   :  { %v980_v39 = vadd.f32 %v976_v36, %v910_v28  ;;  %v974_v42 = vmul.f32 %v973_v38, %v2017_v63  ;;  %v977_v43 = vmul.f32 %v970_v37, %v2034_v23  ;;  %v1011_v55 = vmax.f32 %v1007_v49, 0.0 }
 0x2e8   :  { %v996_v46 = vadd.f32 %v992_v40, %v980_v39  ;;  %v978_v47 = vadd.f32 %v974_v42, %v900_v61  ;;  %v981_v48 = vadd.f32 %v977_v43, %v914_v33 }
 0x2ea   :  { %v1008_v50 = vadd.f32 %v1475_v44, %v996_v46  ;;  %v994_v51 = vadd.f32 %v990_v45, %v978_v47  ;;  %v997_v52 = vadd.f32 %v993_v34, %v981_v48 }
 0x2ec   :  { %v1006_v53 = vadd.f32 %v1475_v44, %v994_v51  ;;  %v1009_v54 = vadd.f32 %v1475_v44, %v997_v52  ;;  %v1012_v56 = vmax.f32 %v1008_v50, 0.0 }
 0x2ee   :  { %v1010_v57 = vmax.f32 %v1006_v53, 0.0  ;;  %v1013_v58 = vmax.f32 %v1009_v54, 0.0 }
 0x2f0   :  { %v1015_v59 = vpack.c.bf16 %v1013_v58, %v1012_v56  ;;  %v1014_v60 = vpack.c.bf16 %v1011_v55, %v1010_v57 }
 0x2f2   :  { %1210 = vmatmul.mubr.bf16.vlgmr.msra.gmra.mrb[24].mxu0 %v1014_v60  ;;  %1650 = vmatprep.mubr.bf16.mxu1 %v1014_v60 }
 0x2f3   :  { %1651 = vmatmul.mubr.bf16.vlgmr.msra.gmra.mrb[12].mxu1 %v1015_v59  ;;  %1219 = vmatprep.mubr.bf16.mxu0 %v1801_v1 }
 0x2fa   :  { %1220 = vmatmul.mubr.bf16.gmra.mrb[28].mxu0 %v1015_v59 }
 0x3c5   :  { %v1211_v61 = vpop.f32.mrb[24].mxu0 }
 0x3c6   :  { %v1213_v62 = vpop.f32.mrb[25].mxu0  ;;  %v1652_v0 = vpop.f32.mrb[12].mxu1  ;;  %v1279_v8 = vrot.slane %v1211_v61, 7 }
 0x3c7   :  { %v1215_v5 = vpop.f32.mrb[26].mxu0  ;;  %v1264_v6 = vpop.f32.mrb[13].mxu1  ;;  %v1297_v13 = vrot.slane %v1652_v0, 1 }
 0x3c8   :  { %v1280_v9 = vrot.slane %v1215_v5, 7  ;;  %v1295_v10 = vrot.slane %v1264_v6, 1  ;;  %v1217_v11 = vpop.f32.mrb[27].mxu0  ;;  %v1653_v12 = vpop.f32.mrb[14].mxu1 }
 0x3c9   :  { %v1298_v14 = vrot.slane %v1653_v12, 1  ;;  %v1267_v15 = vpop.f32.mrb[15].mxu1 }
 0x3ca   :  { %v1285_v16 = vsel %vm303_vm0, %v1279_v8, %v1280_v9  ;;  %v1296_v17 = vrot.slane %v1267_v15, 1 }
 0x3cb   :  { %v1288_v1 = vmul.f32 %v1285_v16, %v2023_v4  ;;  %v1299_v18 = vsel %vm340_vm1, %v1297_v13, %v1298_v14  ;;  %v1302_v19 = vsel %vm340_vm1, %v1298_v14, %v1295_v10  ;;  %v1533_v4 = vld [vmem:[%s2314_s4 + $0x3] ss:$0 sm:$0xff] }
 0x3cc   :  { %v1300_v21 = vsel %vm340_vm1, %v1296_v17, %v1297_v13  ;;  %v1301_v22 = vsel %vm340_vm1, %v1295_v10, %v1296_v17  ;;  %v1305_v37 = vmul.f32 %v1299_v18, %v2045_v35  ;;  %v1306_v44 = vmul.f32 %v1302_v19, %v2052_v41 }
 0x3cd   :  { %v1292_v24 = vadd.f32 %v1288_v1, %v1217_v11  ;;  %v1304_v25 = vmul.f32 %v1300_v21, %v2025_v7  ;;  %v1221_v26 = vpop.f32.mrb[28].mxu0  ;;  %v1303_v34 = vmul.f32 %v1301_v22, %v2019_v2 }
 0x3ce   :  { %v1281_v27 = vrot.slane %v1221_v26, 7  ;;  %v1223_v28 = vpop.f32.mrb[29].mxu0 }
 0x3cf   :  { %v1308_v29 = vadd.f32 %v1304_v25, %v1292_v24  ;;  %v1225_v30 = vpop.f32.mrb[30].mxu0 }
 0x3d0   :  { %v1284_v31 = vsel %vm303_vm0, %v1280_v9, %v1281_v27  ;;  %v1282_v32 = vrot.slane %v1225_v30, 7  ;;  %v1227_v33 = vpop.f32.mrb[31].mxu0 }
 0x3d1   :  { %v1289_v36 = vmul.f32 %v1284_v31, %v2031_v20  ;;  %v1320_v38 = vadd.f32 %v1533_v4, %v1308_v29 }
 0x3d2   :  { %v1286_v7 = vsel %vm303_vm0, %v1282_v32, %v1279_v8  ;;  %v1283_v39 = vsel %vm303_vm0, %v1281_v27, %v1282_v32 }
 0x3d3   :  { %v1293_v40 = vadd.f32 %v1289_v36, %v1223_v28  ;;  %1793 = vtanh.f32 %v1320_v38  ;;  %v1287_v42 = vmul.f32 %v1286_v7, %v2017_v63  ;;  %v1290_v43 = vmul.f32 %v1283_v39, %v2034_v23 }
 0x3d5   :  { %v1309_v20 = vadd.f32 %v1305_v37, %v1293_v40  ;;  %v1291_v45 = vadd.f32 %v1287_v42, %v1213_v62  ;;  %v1294_v46 = vadd.f32 %v1290_v43, %v1227_v33 }
 0x3d7   :  { %v1321_v35 = vadd.f32 %v1533_v4, %v1309_v20  ;;  %v1307_v47 = vadd.f32 %v1303_v34, %v1291_v45  ;;  %v1310_v48 = vadd.f32 %v1306_v44, %v1294_v46 }
 0x3d9   :  { %1795 = vtanh.f32 %v1321_v35  ;;  %v1319_v49 = vadd.f32 %v1533_v4, %v1307_v47  ;;  %v1322_v3 = vadd.f32 %v1533_v4, %v1310_v48 }
 0x3db   :  { %1797 = vtanh.f32 %v1319_v49 }
 0x3dc   :  { %1799 = vtanh.f32 %v1322_v3 }
 0x3dd   :  { %v1794_v50 = vpop.eup %1793 }
 0x3de   :  { %1328 = vst [vmem:[%s2315_s5 + $0x8] sm:$0xff] %v1794_v50 }
 0x3e3   :  { %v1796_v63 = vpop.eup %1795 }
 0x3e4   :  { %1329 = vst [vmem:[%s2315_s5 + $0x10] sm:$0xff] %v1796_v63 }
 0x3e5   :  { %v1798_v2 = vpop.eup %1797 }
 0x3e6   :  { %v1800_v23 = vpop.eup %1799  ;;  %1327 = vst [vmem:[%s2315_s5] sm:$0xff] %v1798_v2 }
 0x3e7   :  { %1330 = vst [vmem:[%s2315_s5 + $0x18] sm:$0xff] %v1800_v23 }

</bundles_post_ra>
